<compile_context>
chip_gen: v7x
topology: tpu7x:2x2x1
jax: 0.10.0
libtpu: 0.0.40
codegen_flags: <defaults>
</compile_context>

<pallas_src>
import jax
import jax.numpy as jnp
from jax import lax
from jax.experimental import pallas as pl
from jax.experimental.pallas import tpu as pltpu

_LANE = 128
_SUB = 8
_TS_MAX = 1024  # sublane-chunks per spatial tile (1024*128 f32 = 512 KiB per (sample,chan))


def _vmem_capacity_bytes():
    """Physical VMEM per TensorCore; conservative fallback = 64 MiB (v7x)."""
    try:
        info = pltpu.get_tpu_info()
        cap = getattr(info, "vmem_capacity_bytes", None)
        if cap:
            return int(cap)
    except Exception:
        pass
    return 64 * 1024 * 1024


def _make_wcce_kernel(N, S, TB, TS, ragged_spatial, out_rows):
    """Kernel over one (TB, C, TS, 128) block -> one (1, 1, out_rows, 128) partial-sum tile."""

    def kernel(inpt_ref, targ_ref, wmap_ref, out_ref):
        wm = wmap_ref[...]                                        # (C, TS, 128) f32

        if ragged_spatial:
            s_idx = lax.broadcasted_iota(jnp.int32, (TS, _LANE), 0)
            valid = (pl.program_id(0) * TS + s_idx) < S           # (TS, 128) bool

        # Number of real samples in this batch block (handles the ragged last batch block
        # without any wrapper padding of the big arrays).
        nb = jnp.minimum(TB, N - pl.program_id(1) * TB)

        def body(i, acc):
            x = inpt_ref[i].astype(jnp.float32)                   # (C, TS, 128)
            t = targ_ref[i].astype(jnp.float32)
            if ragged_spatial:
                # Zero out the out-of-bounds tail of a ragged spatial block (its VMEM
                # contents are undefined) so exp/log stay finite and contributions are 0.
                x = jnp.where(valid[None], x, 0.0)
                t = jnp.where(valid[None], t, 0.0)
            # log_softmax over channels, folded algebraically:
            #   sum_c t*wm*(z - lse) = A - lse*B ;  z = x - max_c x ; lse = log sum_c exp(z)
            # C is a leading (untiled) dim -> pure VPU elementwise reductions across vregs.
            m = jnp.max(x, axis=0, keepdims=True)                 # (1, TS, 128)
            z = x - m
            lse = jnp.log(jnp.sum(jnp.exp(z), axis=0))            # (TS, 128)
            tw = t * wm                                           # (C, TS, 128)
            a = jnp.sum(tw * z, axis=0)                           # (TS, 128)
            bsum = jnp.sum(tw, axis=0)                            # (TS, 128)
            return acc + (a - lse * bsum)

        partial = lax.fori_loop(0, nb, body, jnp.zeros((TS, _LANE), jnp.float32))

        if out_rows == TS:
            folded = partial                                      # (TS, 128)
        else:
            folded = jnp.sum(partial.reshape(TS // _SUB, _SUB, _LANE), axis=0)  # (8, 128)
        out_ref[...] = folded[None, None]

    return kernel


def weighted_categorical_crossentropy_pallas(inpt, targ, fg_weight):
    """inpt, targ: (N, C, H, W); fg_weight: scalar. Returns scalar f32 loss."""
    N, C, H, W = inpt.shape
    if N < 2:
        # PyTorch's targ[1] would raise for N < 2; JAX would silently clamp, so check here.
        raise ValueError("WeightedCategoricalCrossentropy requires batch size >= 2 (uses targ[1]).")
    HW = H * W
    total = N * C * HW

    # Foreground weight map from targ[1] (second batch sample, as in the PyTorch code),
    # broadcast over the batch:  wmap = fg*w + (1-fg), shape (C, HW).  Tiny; computed once.
    w = jnp.asarray(fg_weight, dtype=jnp.float32)
    fg = (targ[1] == 1).astype(jnp.float32).reshape(C, HW)
    wmap = fg * w + (1.0 - fg)

    inpt3 = inpt.reshape(N, C, HW)
    targ3 = targ.reshape(N, C, HW)

    # The dense (S, 128) layout needs H*W to be a multiple of 128.  Typical segmentation
    # shapes (and the test) already satisfy this, so the big arrays are NOT copied; the pad
    # below (one extra HBM pass) only triggers for odd spatial sizes.
    HWp = pl.cdiv(HW, _LANE) * _LANE
    if HWp != HW:
        inpt3 = jnp.pad(inpt3, ((0, 0), (0, 0), (0, HWp - HW)))
        targ3 = jnp.pad(targ3, ((0, 0), (0, 0), (0, HWp - HW)))
        wmap = jnp.pad(wmap, ((0, 0), (0, HWp - HW)), constant_values=1.0)
    S = HWp // _LANE

    inpt4 = inpt3.reshape(N, C, S, _LANE)   # contiguous reshape, free
    targ4 = targ3.reshape(N, C, S, _LANE)

    item_in = jnp.dtype(inpt.dtype).itemsize
    item_tg = jnp.dtype(targ.dtype).itemsize

    # ---- generation-aware VMEM budget --------------------------------------
    vmem_cap = _vmem_capacity_bytes()                      # 128 MiB v5e/v6e, 64 MiB v7x
    vmem_limit = min(vmem_cap * 3 // 4, 96 * 1024 * 1024)  # explicit scoped limit for this call
    usable = int(vmem_limit * 0.85)                        # headroom for compiler scratch

    def _fixed_bytes(ts):
        # ~6 per-sample f32 loop temps (C,TS,128) + double-buffered wmap block + accumulator
        # + output buffers.
        return (6 * C + 2 * C + 3) * ts * _LANE * 4

    def _per_tb_bytes(ts):
        # double-buffered inpt + targ blocks per sample.
        return 2 * C * ts * _LANE * (item_in + item_tg)

    # Spatial tile: full-dim block when it fits, else a multiple-of-8 tile (ragged tail masked).
    TS = S if S <= _TS_MAX else _TS_MAX
    while TS > _SUB and _fixed_bytes(TS) + _per_tb_bytes(TS) > usable:
        TS = max(_SUB, ((TS // 2) // _SUB) * _SUB)

    # Batch tile from the remaining budget.
    TB = max(1, (usable - _fixed_bytes(TS)) // _per_tb_bytes(TS))
    TB = min(TB, N)
    grid_h = pl.cdiv(S, TS)
    grid_b = pl.cdiv(N, TB)

    # Guarantee >= 2 grid steps so v7x megacore can shard across both TensorCores.
    if grid_h * grid_b == 1:
        if N >= 2:
            TB = (N + 1) // 2
            grid_b = pl.cdiv(N, TB)
        elif S >= 2 * _SUB:
            TS = ((S // 2 + _SUB - 1) // _SUB) * _SUB
            grid_h = pl.cdiv(S, TS)

    ragged_spatial = (grid_h * TS != S)
    out_rows = _SUB if TS % _SUB == 0 else TS

    # wmap laid out as (C, grid_h*TS, 128); tiny zero-pad keeps its blocks always in-bounds.
    S_w = grid_h * TS
    wmap3 = wmap.reshape(C, S, _LANE)
    if S_w != S:
        wmap3 = jnp.pad(wmap3, ((0, 0), (0, S_w - S), (0, 0)))

    kernel = _make_wcce_kernel(N, S, TB, TS, ragged_spatial, out_rows)

    cost = pl.CostEstimate(
        flops=int(8 * N * C * HW),
        transcendentals=int(N * C * HW + N * HW),          # exp per element + log per position
        bytes_accessed=int(N * C * HW * (item_in + item_tg) + C * HW * 4
                           + grid_h * grid_b * out_rows * _LANE * 4),
    )

    # Grid order: spatial chunk outer, batch chunk inner -> wmap block index is constant
    # across the inner sweep.  Each grid cell writes its own lane-dense partial tile; the
    # tiny cross-tile reduce / negate / mean happens once in JAX.
    partials = pl.pallas_call(
        kernel,
        out_shape=jax.ShapeDtypeStruct((grid_h, grid_b, out_rows, _LANE), jnp.float32),
        grid_spec=pltpu.PrefetchScalarGridSpec(
            num_scalar_prefetch=0,
            grid=(grid_h, grid_b),
            in_specs=[
                pl.BlockSpec((TB, C, TS, _LANE), lambda h, b: (b, 0, h, 0)),  # inpt
                pl.BlockSpec((TB, C, TS, _LANE), lambda h, b: (b, 0, h, 0)),  # targ
                pl.BlockSpec((C, TS, _LANE), lambda h, b: (0, h, 0)),         # wmap
            ],
            out_specs=pl.BlockSpec((1, 1, out_rows, _LANE), lambda h, b: (h, b, 0, 0)),
        ),
        compiler_params=pltpu.CompilerParams(
            dimension_semantics=("parallel", "parallel"),
            vmem_limit_bytes=int(vmem_limit),
        ),
        cost_estimate=cost,
    )(inpt4, targ4, wmap3)

    return -(jnp.sum(partials) / jnp.float32(total))


class WeightedCategoricalCrossentropy:
    """JAX/Pallas port of the PyTorch module (weight passed at construction)."""

    def __init__(self, weight):
        self.weight = jnp.asarray(weight, dtype=jnp.float32)

    def __call__(self, inpt, targ):
        return weighted_categorical_crossentropy_pallas(inpt, targ, self.weight)


def _reference(inpt, targ, fg_weight):
    # Pure-JAX reproduction of the PyTorch forward for validation.
    w = jnp.asarray(fg_weight, dtype=jnp.float32)
    log_sm = jax.nn.log_softmax(inpt.astype(jnp.float32), axis=1)
    losses = targ.astype(jnp.float32) * log_sm
    fg = (targ[1] == 1).astype(jnp.float32)
    weighted = fg * w * losses + losses * (1.0 - fg)
    return -jnp.mean(weighted)


if __name__ == "__main__":
    key = jax.random.PRNGKey(0)
    N, C, H, W = 2, 4, 16, 16

    k1, k2 = jax.random.split(key)
    inpt = jax.random.normal(k1, (N, C, H, W), dtype=jnp.float32)          # NCHW logits
    labels = jax.random.randint(k2, (N, H, W), 0, C)
    targ = jnp.transpose(jax.nn.one_hot(labels, C, dtype=jnp.float32),
                         (0, 3, 1, 2))                                     # NCHW one-hot

    fg_weight = 2.0                                                        # scalar fg weight

    loss_fn = WeightedCategoricalCrossentropy(fg_weight)
    loss = loss_fn(inpt, targ)
    loss = jax.block_until_ready(loss)

    ref = _reference(inpt, targ, fg_weight)
    assert jnp.allclose(loss, ref, rtol=1e-5, atol=1e-6), (float(loss), float(ref))

    print("KERNEL_OK")
</pallas_src>

<mosaic_0001>
module attributes {stable_mosaic.version = 11 : i64} {
  func.func @kernel(%arg0: i32, %arg1: i32, %arg2: memref<1x4x2x128xf32, #tpu.memory_space<vmem>>, %arg3: memref<1x4x2x128xf32, #tpu.memory_space<vmem>>, %arg4: memref<4x2x128xf32, #tpu.memory_space<vmem>>, %arg5: memref<1x1x2x128xf32, #tpu.memory_space<vmem>>) attributes {dimension_semantics = [#tpu.dimension_semantics<parallel>, #tpu.dimension_semantics<parallel>], iteration_bounds = array<i64: 1, 2>, scalar_prefetch = 0 : i64, scratch_operands = 0 : i64, tpu.core_type = #tpu.core_type<tc>, window_params = [{transform_indices = @transform_0, window_bounds = array<i64: 1, 4, 2, 128>}, {transform_indices = @transform_1, window_bounds = array<i64: 1, 4, 2, 128>}, {transform_indices = @transform_2, window_bounds = array<i64: 4, 2, 128>}, {transform_indices = @transform_3, window_bounds = array<i64: 1, 1, 2, 128>}]} {
    %c0 = arith.constant 0 : index
    %c0_0 = arith.constant 0 : index
    %c0_1 = arith.constant 0 : index
    %0 = vector.load %arg4[%c0, %c0_0, %c0_1] : memref<4x2x128xf32, #tpu.memory_space<vmem>>, vector<4x2x128xf32>
    %c1_i32 = arith.constant 1 : i32
    %1 = arith.muli %arg1, %c1_i32 : i32
    %c2_i32 = arith.constant 2 : i32
    %2 = arith.subi %c2_i32, %1 : i32
    %c1_i32_2 = arith.constant 1 : i32
    %3 = arith.minsi %c1_i32_2, %2 : i32
    %cst = arith.constant 0.000000e+00 : f32
    %4 = vector.broadcast %cst : f32 to vector<2x128xf32>
    %c0_i32 = arith.constant 0 : i32
    %5 = arith.subi %3, %c0_i32 : i32
    %6 = arith.addi %c0_i32, %5 : i32
    %c1_i32_3 = arith.constant 1 : i32
    %7 = scf.for %arg6 = %c0_i32 to %6 step %c1_i32_3 iter_args(%arg7 = %4) -> (vector<2x128xf32>)  : i32 {
      %10 = arith.index_cast %arg6 : i32 to index
      %c0_8 = arith.constant 0 : index
      %c0_9 = arith.constant 0 : index
      %c0_10 = arith.constant 0 : index
      %11 = vector.load %arg2[%10, %c0_8, %c0_9, %c0_10] : memref<1x4x2x128xf32, #tpu.memory_space<vmem>>, vector<1x4x2x128xf32>
      %12 = vector.shape_cast %11 : vector<1x4x2x128xf32> to vector<4x2x128xf32>
      %13 = arith.index_cast %arg6 : i32 to index
      %c0_11 = arith.constant 0 : index
      %c0_12 = arith.constant 0 : index
      %c0_13 = arith.constant 0 : index
      %14 = vector.load %arg3[%13, %c0_11, %c0_12, %c0_13] : memref<1x4x2x128xf32, #tpu.memory_space<vmem>>, vector<1x4x2x128xf32>
      %15 = vector.shape_cast %14 : vector<1x4x2x128xf32> to vector<4x2x128xf32>
      %cst_14 = arith.constant dense<0xFF800000> : vector<2x128xf32>
      %16 = vector.multi_reduction <maximumf>, %12, %cst_14 [0] : vector<4x2x128xf32> to vector<2x128xf32>
      %17 = vector.shape_cast %16 : vector<2x128xf32> to vector<1x2x128xf32>
      %18 = vector.broadcast %17 : vector<1x2x128xf32> to vector<4x2x128xf32>
      %19 = arith.subf %12, %18 : vector<4x2x128xf32>
      %20 = math.exp %19 : vector<4x2x128xf32>
      %cst_15 = arith.constant dense<0.000000e+00> : vector<2x128xf32>
      %21 = vector.multi_reduction <add>, %20, %cst_15 [0] : vector<4x2x128xf32> to vector<2x128xf32>
      %22 = math.log %21 : vector<2x128xf32>
      %23 = arith.mulf %15, %0 : vector<4x2x128xf32>
      %24 = arith.mulf %23, %19 : vector<4x2x128xf32>
      %cst_16 = arith.constant dense<0.000000e+00> : vector<2x128xf32>
      %25 = vector.multi_reduction <add>, %24, %cst_16 [0] : vector<4x2x128xf32> to vector<2x128xf32>
      %cst_17 = arith.constant dense<0.000000e+00> : vector<2x128xf32>
      %26 = vector.multi_reduction <add>, %23, %cst_17 [0] : vector<4x2x128xf32> to vector<2x128xf32>
      %27 = arith.mulf %22, %26 : vector<2x128xf32>
      %28 = arith.subf %25, %27 : vector<2x128xf32>
      %29 = arith.addf %arg7, %28 : vector<2x128xf32>
      scf.yield %29 : vector<2x128xf32>
    }
    %8 = vector.shape_cast %7 : vector<2x128xf32> to vector<1x1x2x128xf32>
    %c0_4 = arith.constant 0 : index
    %c0_5 = arith.constant 0 : index
    %c0_6 = arith.constant 0 : index
    %c0_7 = arith.constant 0 : index
    %9 = vector.load %arg5[%c0_4, %c0_5, %c0_6, %c0_7] : memref<1x1x2x128xf32, #tpu.memory_space<vmem>>, vector<1x1x2x128xf32>
    tpu.vector_store %arg5[%c0_4, %c0_5, %c0_6, %c0_7], %8 {strides = array<i32>} : memref<1x1x2x128xf32, #tpu.memory_space<vmem>>, vector<1x1x2x128xf32>,
    return
  }
  func.func @transform_0(%arg0: i32, %arg1: i32) -> (i32, i32, i32, i32) {
    %c0_i32 = arith.constant 0 : i32
    %c0_i32_0 = arith.constant 0 : i32
    %c0_i32_1 = arith.constant 0 : i32
    return %arg1, %c0_i32, %arg0, %c0_i32_0 : i32, i32, i32, i32
  }
  func.func @transform_1(%arg0: i32, %arg1: i32) -> (i32, i32, i32, i32) {
    %c0_i32 = arith.constant 0 : i32
    %c0_i32_0 = arith.constant 0 : i32
    %c0_i32_1 = arith.constant 0 : i32
    return %arg1, %c0_i32, %arg0, %c0_i32_0 : i32, i32, i32, i32
  }
  func.func @transform_2(%arg0: i32, %arg1: i32) -> (i32, i32, i32) {
    %c0_i32 = arith.constant 0 : i32
    %c0_i32_0 = arith.constant 0 : i32
    %c0_i32_1 = arith.constant 0 : i32
    return %c0_i32, %arg0, %c0_i32_0 : i32, i32, i32
  }
  func.func @transform_3(%arg0: i32, %arg1: i32) -> (i32, i32, i32, i32) {
    %c0_i32 = arith.constant 0 : i32
    %c0_i32_0 = arith.constant 0 : i32
    %c0_i32_1 = arith.constant 0 : i32
    return %arg0, %arg1, %c0_i32, %c0_i32_0 : i32, i32, i32, i32
  }
}

</mosaic_0001>

<bundles_post_ra>
// kernel: tpu_custom_call.1
= control target key start
LH: loop header
LB: loop body
LE: loop exit
PB: predicated region body
PF: predicated region fallthrough
CT: control target
= control target key end

     0   :  { %s1190_s0 = inlined_call_operand.hbm [shape: f32[2,4,2,128], index: 0, kind: input, shape index: {}]   ;;  %s1191_s1 = inlined_call_operand.hbm [shape: f32[2,4,2,128], index: 1, kind: input, shape index: {}]   ;;  %s1192_s2 = inlined_call_operand.hbm [shape: f32[4,2,128], index: 2, kind: input, shape index: {}]   ;;  %s1193_s3 = inlined_call_operand.hbm [shape: f32[1,2,2,128], index: 3, kind: output, shape index: {}]  }
   0x1   :  { %1201 = sst [smem:[#allocation13_spill]] %s1190_s0 }
   0x2   :  { %1202 = sst [smem:[#allocation14_spill]] %s1192_s2 }
   0x3   :  { %8 = vsyncpa [#allocation3], 0 }
   0x4   :  { %10 = vsyncpa [#allocation3 + $0x1], 0 }
   0x5   :  { %11 = vsyncpa [#allocation6], 0 }
   0x6   :  { %13 = vsyncpa [#allocation6 + $0x1], 0 }
   0x7   :  { %14 = vsyncpa [#allocation4], 0 }
   0x8   :  { %16 = vsyncpa [#allocation4 + $0x1], 0  ;;  %s867_s12 = smov 0   ;;  %s869_s13 = smov 0  }
   0x9   :  { %s871_s14 = smov 0   ;;  %s873_s15 = smov 0  }
   0xa   :  { %s875_s16 = smov 0   ;;  %s877_s17 = smov 0  }
   0xb LB: > { %s898_s18 = sadd.s32 4294967295, %s827_s17   ;;  %s497_s19 = sadd.s32 4294967294, %s827_s17   ;;  %s827_s17 = sphi %s877_s17, %s22_s17   ;;  %s823_s16 = sphi %s875_s16, %s1227_s16   ;;  %s819_s15 = sphi %s873_s15, %s1226_s15   ;;  %s815_s14 = sphi %s871_s14, %s1225_s14   ;;  %s811_s13 = sphi %s869_s13, %s1224_s13   ;;  %s807_s12 = sphi %s867_s12, %s1223_s12  }
   0xc   : > { %p56_p0 = scmp.ne.s32.totalorder %s811_s13, %s807_s12  ;;  %p1194_p1 = scmp.eq.s32.totalorder %s898_s18, 0 }
   0xd   : > { %p142_p3 = scmp.eq.s32.totalorder %s497_s19, 1  ;;  %p498_p5 = scmp.ge.s32.totalorder %s827_s17, 1 }
   0xe   : > { %p907_p4 = por %p1194_p1, %p56_p0  ;;  %p149_p7 = scmp.lt.s32.totalorder %s827_s17, 3 }
   0xf   : > { %p912_p6 = por %p142_p3, %p56_p0  ;;  %s841_s23 = smov [#allocation7]  }
  0x10   : > { %s1203_s20 = scalar_select %p907_p4, 1, 0 }
  0x11   : > { %s1204_s21 = scalar_select %p912_p6, 1, 0 }
  0x12   : > { %p917_p8 = pnand %p498_p5, %p149_p7  ;;  %s163_s24 = sshll.u32 %s841_s23, 4  ;;  %s164_s24 = int_to_ptr.vmem [resolvable:$true] %s163_s24 }
  0x13   : > { %s31_s26 = sadd.s32 1, %s823_s16  ;;  %s1207_s2 = sld [smem:[#allocation14_spill]] }
  0x14   : > { %s1205_s22 = scalar_select %p917_p8, 1, 0 }
  0x15   : > { %p533_p9 = pneg %p917_p8 }
  0x17   : > { %p926_p11 = pnand %p533_p9, %p1194_p1 }
  0x19   : > { %s637_s29 = scalar_lea.hbm %s1207_s2, 128  ;;  %p639_p13 = pneg %p926_p11 }
  0x1a   : > { %p638_p12 = scmp.ne.s32.totalorder %s1207_s2, %s637_s29  ;;  %p644_p5 = scmp.lt.u32.totalorder %s637_s29, %s1207_s2 }
  0x1c   : > { %p640_p0 = pnand %p639_p13, %p638_p12 }
  0x1e   : > { %p641_p3 = pneg %p640_p0 }
  0x20   : > { %p646_p7 = pnand %p644_p5, %p641_p3 }
  0x22   : > { %649 = shalt.err (!%p646_p7)
}
  0x23   : > { %s650_s7 = scalar_lea.vmem %s164_s24, 128  ;;  %p658_p2 = scmp.lt.s32.totalorder %s164_s24, %s164_s24 }
  0x24   : > { %p651_p9 = scmp.ne.s32.totalorder %s164_s24, %s650_s7  ;;  %p659_p6 = scmp.lt.s32.totalorder %s650_s7, %s650_s7 }
  0x26   : > { %p653_p10 = pnand %p651_p9, %p639_p13  ;;  %p660_p4 = por %p659_p6, %p658_p2 }
  0x28   : > { %p654_p1 = pneg %p653_p10 }
  0x2a   : > { %p661_p8 = pnand %p660_p4, %p654_p1 }
  0x2c   : > { %664 = shalt.err (!%p661_p8)
}
  0x2d   : > { %s1197_s8 = smov 32   ;;  %s1199_s9 = smov 2  }
  0x2e   : > { %536 = dma.hbm_to_vmem [thread:$0]  (!%p926_p11), %s1207_s2, 128, %s164_s24, [#allocation6], %s1197_s8, %s1197_s8, %s1199_s9  }
  0x2f   : > { %p32_p1 = scmp.ge.s32.totalorder %s31_s26, 2  ;;  %s43_s19 = sadd.s32 1, %s815_s14 }
  0x30   : > { %p50_p2 = scmp.ne.s32.totalorder %s815_s14, %s811_s13  ;;  %p51_p4 = scmp.eq.s32.totalorder %s827_s17, 0 }
  0x31   : > { %s1229_s26 = smov (%p32_p1, %s31_s26), 0  ;;  %p1209_p8 = scmp.eq.s32.totalorder %s898_s18, 1 }
  0x32   : > { %p956_p6 = por %p51_p4, %p50_p2  ;;  %s38_s27 = ssub.s32 %s823_s16, %s1229_s26 }
  0x33   : > { %p962_p10 = por %p1209_p8, %p50_p2  ;;  %p549_p12 = scmp.lt.s32.totalorder %s827_s17, 2 }
  0x34   : > { %p41_p11 = scmp.eq.s32.totalorder %s38_s27, 0  ;;  %s177_s24 = sand.u32 1, %s815_s14  }
  0x35   : > { %s501_s28 = sshll.u32 %s177_s24, 3  ;;  %s518_s30 = sshll.u32 %s823_s16, 7 }
  0x36   : > { %s971_s29 = scalar_select %p41_p11, %s815_s14, %s43_s19  }
  0x37   : > { %s1211_s0 = sld [smem:[#allocation13_spill]]  ;;  %s181_s7 = scalar_lea.vmem [#allocation2], %s501_s28 }
  0x38   : > { %s189_s10 = sshll.u32 %s181_s7, 4  ;;  %p983_p13 = pnand %p549_p12, %p956_p6  ;;  %s979_s10 = int_to_ptr.vmem [resolvable:$true] %s189_s10 }
  0x39   : > { %s990_s4 = scalar_lea.hbm %s1191_s1, %s518_s30  ;;  %s203_s5 = scalar_lea.vmem [#allocation5], %s501_s28 }
  0x3a   : > { %s992_s8 = sshll.u32 %s203_s5, 4  ;;  %s994_s9 = scalar_lea.sflag [#allocation3], %s177_s24  ;;  %s1026_s8 = int_to_ptr.vmem [resolvable:$true] %s992_s8 }
  0x3b   : > { %p667_p3 = pneg %p983_p13 }
  0x3d   : > { %s977_s6 = scalar_lea.hbm %s1211_s0, %s518_s30  ;;  %s670_s19 = scalar_lea.hbm %s1211_s0, 256 }
  0x3e   : > { %s665_s7 = scalar_lea.hbm %s977_s6, 128  ;;  %p671_p9 = scmp.lt.u32.totalorder %s977_s6, %s1211_s0 }
  0x3f   : > { %p666_p0 = scmp.ne.s32.totalorder %s977_s6, %s665_s7  ;;  %p672_p1 = scmp.lt.u32.totalorder %s670_s19, %s665_s7 }
  0x40   : > { %p674_p4 = scmp.lt.u32.totalorder %s665_s7, %s977_s6 }
  0x41   : > { %p668_p5 = pnand %p667_p3, %p666_p0  ;;  %p673_p2 = por %p672_p1, %p671_p9 }
  0x43   : > { %p669_p7 = pneg %p668_p5  ;;  %p675_p6 = por %p674_p4, %p673_p2 }
  0x45   : > { %p676_p8 = pnand %p675_p6, %p669_p7 }
  0x47   : > { %679 = shalt.err (!%p676_p8)
}
  0x48   : > { %s680_s24 = scalar_lea.vmem %s979_s10, 128  ;;  %s844_s2 = smov [#allocation2]  }
  0x49   : > { %p681_p12 = scmp.ne.s32.totalorder %s979_s10, %s680_s24  ;;  %s685_s28 = sshll.u32 %s844_s2, 4  ;;  %s686_s28 = int_to_ptr.vmem [resolvable:$false] %s685_s28 }
  0x4a   : > { %s687_s5 = scalar_lea.vmem %s686_s28, 256  ;;  %p688_p5 = scmp.lt.s32.totalorder %s979_s10, %s686_s28 }
  0x4b   : > { %p683_p11 = pnand %p681_p12, %p667_p3  ;;  %p689_p9 = scmp.lt.s32.totalorder %s687_s5, %s680_s24 }
  0x4d   : > { %p684_p0 = pneg %p683_p11  ;;  %p690_p1 = por %p689_p9, %p688_p5 }
  0x4f   : > { %p691_p2 = pnand %p690_p1, %p684_p0 }
  0x51   : > { %694 = shalt.err (!%p691_p2)
}
  0x52   : > { %s1213_s7 = smov 2   ;;  %s1214_s23 = smov 32  }
  0x53   : > { %540 = dma.hbm_to_vmem [thread:$0]  (!%p983_p13), %s977_s6, 128, %s979_s10, %s994_s9, %s1214_s23, %s1214_s23, %s1213_s7  }
  0x54   : > { %s199_s19 = sand.u32 1, %s827_s17   ;;  %s695_s30 = scalar_lea.hbm %s990_s4, 128 }
  0x55   : > { %s1029_s27 = scalar_lea.sflag [#allocation6], %s199_s19  ;;  %p696_p7 = scmp.ne.s32.totalorder %s990_s4, %s695_s30 }
  0x56   : > { %s700_s28 = scalar_lea.hbm %s1191_s1, 256  ;;  %p701_p8 = scmp.lt.u32.totalorder %s990_s4, %s1191_s1 }
  0x57   : > { %p698_p4 = pnand %p696_p7, %p667_p3  ;;  %p702_p12 = scmp.lt.u32.totalorder %s700_s28, %s695_s30 }
  0x58   : > { %p704_p0 = scmp.lt.u32.totalorder %s695_s30, %s990_s4 }
  0x59   : > { %p699_p6 = pneg %p698_p4  ;;  %p703_p11 = por %p702_p12, %p701_p8 }
  0x5b   : > { %p705_p5 = por %p704_p0, %p703_p11 }
  0x5d   : > { %p706_p9 = pnand %p705_p5, %p699_p6 }
  0x5f   : > { %709 = shalt.err (!%p706_p9)
}
  0x60   : > { %s710_s9 = scalar_lea.vmem %s1026_s8, 128  ;;  %s845_s6 = smov [#allocation5]  }
  0x61   : > { %p711_p1 = scmp.ne.s32.totalorder %s1026_s8, %s710_s9  ;;  %s715_s10 = sshll.u32 %s845_s6, 4  ;;  %s716_s10 = int_to_ptr.vmem [resolvable:$false] %s715_s10 }
  0x62   : > { %s717_s0 = scalar_lea.vmem %s716_s10, 256  ;;  %p718_p4 = scmp.lt.s32.totalorder %s1026_s8, %s716_s10 }
  0x63   : > { %p713_p2 = pnand %p711_p1, %p667_p3  ;;  %p719_p8 = scmp.lt.s32.totalorder %s717_s0, %s710_s9 }
  0x65   : > { %p714_p7 = pneg %p713_p2  ;;  %p720_p12 = por %p719_p8, %p718_p4 }
  0x67   : > { %p721_p11 = pnand %p720_p12, %p714_p7 }
  0x69   : > { %724 = shalt.err (!%p721_p11)
}
  0x6a   : > { %543 = dma.hbm_to_vmem [thread:$0]  (!%p983_p13), %s990_s4, 128, %s1026_s8, %s1029_s27, %s1214_s23, %s1214_s23, %s1213_s7  }
  0x6b   : > { %p1215_p3 = scmp.ne.s32.totalorder %s1205_s22, 0 }
  0x6c   : > { %s1061_s19 = sand.u32 (!%p1215_p3), 1, %s811_s13   ;;  %p1216_p6 = scmp.ne.s32.totalorder (!%p1215_p3), %s1203_s20, 0 }
  0x6d   : > { %223 = sbr.rel (%p1215_p3) target bundleno = 210 (0xd2), region = 32  ;;  %s508_s30 = sshll.u32 (!%p1215_p3), %s1061_s19, 3 }
  0x6e   : > { %s226_s24 = scalar_lea.sflag (!%p1215_p3), [#allocation3], %s1061_s19  ;;  %s1065_s2 = scalar_lea.vmem (!%p1215_p3), [#allocation2], %s508_s30 }
  0x74   : > { %790 = dma.done.wait (%p1216_p6), %s226_s24, 128  }
  0x75   : > { %792 = vsyncadd (%p1216_p6), %s226_s24, 4294967168  ;;  %s234_s8 = sand.u32 1, %s898_s18   ;;  %s1072_s11 = scalar_lea.vmem [#allocation5], %s508_s30 }
  0x76   : > { %s235_s22 = scalar_lea.sflag [#allocation6], %s234_s8 }
  0x77   : > { %794 = dma.done.wait (%p1216_p6), %s235_s22, 128  }
  0x78   : > { %796 = vsyncadd (%p1216_p6), %s235_s22, 4294967168  ;;  %p1217_p13 = scmp.eq.s32.totalorder %s898_s18, 0 }
  0x7a   : > { %798 = dma.done.wait (%p1217_p13), [#allocation6], 128   ;;  %p1218_p0 = pmov %p1217_p13 }
  0x7b   : > { %s511_s4 = sshll.u32 %s1061_s19, 1  ;;  %s274_s7 = ssub.s32 2, %s819_s15  ;;  %v1086_v0 = vld [vmem:[#allocation7] sm:$0x3]  ;;  %v1088_v1 = vld [vmem:[#allocation7 + $0x2] sm:$0x3] }
  0x7c   : > { %800 = vsyncadd (%p1218_p0), [#allocation6], 4294967168  ;;  %p275_p5 = scmp.lt.s32.totalorder %s274_s7, 1  ;;  %v1090_v2 = vld [vmem:[#allocation7 + $0x4] sm:$0x3]  ;;  %s1094_s20 = scalar_lea.vmem [#allocation8], %s511_s4 }
  0x7d   : > { %v1092_v3 = vld [vmem:[#allocation7 + $0x6] sm:$0x3]  ;;  %p520_p9 = scmp.le.s32.totalorder %s274_s7, 0  ;;  %v1096_v4 = vmov 0.0  }
  0x7e   : > { %s1084_s23 = scalar_select %p275_p5, %s274_s7, 1 }
  0x7f   : > { %441 = sbr.rel (%p520_p9) target bundleno = 186 (0xba), region = 98  ;;  %v1098_v5 = vmov (!%p520_p9), 0.0   ;;  %s1100_s18 = smov (!%p520_p9), 0  }
  0x86 LB: >> { %s513_s27 = sshll.u32 %s835_s18, 3  ;;  %vm295_vm0 = vcmask 1041408   ;;  %s280_s18 = sadd.s32 1, %s835_s18   ;;  %s835_s18 = sphi %s1100_s18, %s280_s18   ;;  %v831_v5 = vphi %v1098_v5, %v1219_v5  }
  0x87   : >> { %s285_s28 = scalar_lea.vmem %s1065_s2, %s513_s27 [#allocation2]  ;;  %s290_s5 = scalar_lea.vmem %s1072_s11, %s513_s27 [#allocation5] }
  0x88   : >> { %v286_v6 = vld [vmem:[%s285_s28] sm:$0x3]  ;;  %v287_v7 = vld [vmem:[%s285_s28 + $0x2] sm:$0x3]  ;;  %v288_v8 = vld [vmem:[%s285_s28 + $0x4] sm:$0x3]  ;;  %p279_p1 = scmp.ge.s32.totalorder %s280_s18, %s1084_s23 }
  0x89   : >> { %v289_v9 = vld [vmem:[%s285_s28 + $0x6] sm:$0x3]  ;;  %v296_v10 = vsel %vm295_vm0, %v286_v6, -inf  ;;  %v297_v11 = vsel %vm295_vm0, %v287_v7, -inf  ;;  %v298_v12 = vsel %vm295_vm0, %v288_v8, -inf }
  0x8a   : >> { %v299_v13 = vsel %vm295_vm0, %v289_v9, -inf  ;;  %v300_v14 = vmax.f32 %v296_v10, %v297_v11  ;;  %v291_v25 = vld [vmem:[%s290_s5] sm:$0x3]  ;;  %v292_v26 = vld [vmem:[%s290_s5 + $0x2] sm:$0x3] }
  0x8b   : >> { %v301_v15 = vmax.f32 %v298_v12, %v299_v13  ;;  %v324_v30 = vmul.f32 %v291_v25, %v1086_v0  ;;  %v325_v31 = vmul.f32 %v292_v26, %v1088_v1  ;;  %v293_v33 = vld [vmem:[%s290_s5 + $0x4] sm:$0x3]  ;;  %v294_v39 = vld [vmem:[%s290_s5 + $0x6] sm:$0x3] }
  0x8c   : >> { %v326_v41 = vmul.f32 %v293_v33, %v1090_v2  ;;  %v327_v47 = vmul.f32 %v294_v39, %v1092_v3 }
  0x8d   : >> { %v302_v16 = vmax.f32 %v300_v14, %v301_v15  ;;  %v339_v45 = vsel %vm295_vm0, %v324_v30, 0.0  ;;  %v340_v46 = vsel %vm295_vm0, %v325_v31, 0.0 }
  0x8e   : >> { %v341_v51 = vadd.f32 %v340_v46, %v339_v45  ;;  %v342_v52 = vsel %vm295_vm0, %v326_v41, 0.0  ;;  %v344_v57 = vsel %vm295_vm0, %v327_v47, 0.0 }
  0x8f   : >> { %v303_v17 = vsub.f32 %v286_v6, %v302_v16  ;;  %v304_v18 = vsub.f32 %v287_v7, %v302_v16  ;;  %v305_v19 = vsub.f32 %v288_v8, %v302_v16  ;;  %v306_v20 = vsub.f32 %v289_v9, %v302_v16 }
  0x90   : >> { %v343_v56 = vadd.f32 %v342_v52, %v341_v51 }
  0x91   : >> { %v307_v21 = vmul.f32 1.442695, %v303_v17  ;;  %v309_v22 = vmul.f32 1.442695, %v304_v18  ;;  %v311_v23 = vmul.f32 1.442695, %v305_v19  ;;  %v328_v42 = vmul.f32 %v324_v30, %v303_v17 }
  0x92   : >> { %v313_v24 = vmul.f32 1.442695, %v306_v20  ;;  %v329_v43 = vmul.f32 %v325_v31, %v304_v18  ;;  %v330_v48 = vmul.f32 %v326_v41, %v305_v19  ;;  %v331_v54 = vmul.f32 %v327_v47, %v306_v20 }
  0x93   : >> { %627 = vpow2.f32 %v307_v21  ;;  %v332_v49 = vsel %vm295_vm0, %v328_v42, 0.0  ;;  %v345_v60 = vadd.f32 %v344_v57, %v343_v56 }
  0x94   : >> { %629 = vpow2.f32 %v309_v22  ;;  %v333_v50 = vsel %vm295_vm0, %v329_v43, 0.0  ;;  %v335_v55 = vsel %vm295_vm0, %v330_v48, 0.0  ;;  %v337_v59 = vsel %vm295_vm0, %v331_v54, 0.0 }
  0x95   : >> { %631 = vpow2.f32 %v311_v23  ;;  %v334_v53 = vadd.f32 %v333_v50, %v332_v49 }
  0x96   : >> { %633 = vpow2.f32 %v313_v24 }
  0x97   : >> { %v336_v58 = vadd.f32 %v335_v55, %v334_v53 }
  0x99   : >> { %v338_v63 = vadd.f32 %v337_v59, %v336_v58 }
  0x9d   : >> { %v628_v27 = vpop.eup %627 }
  0x9e   : >> { %v630_v28 = vpop.eup %629  ;;  %v315_v29 = vsel %vm295_vm0, %v628_v27, 0.0 }
  0x9f   : >> { %v632_v32 = vpop.eup %631  ;;  %v316_v34 = vsel %vm295_vm0, %v630_v28, 0.0 }
  0xa0   : >> { %v634_v35 = vpop.eup %633  ;;  %v317_v36 = vadd.f32 %v316_v34, %v315_v29  ;;  %v318_v37 = vsel %vm295_vm0, %v632_v32, 0.0 }
  0xa1   : >> { %v320_v38 = vsel %vm295_vm0, %v634_v35, 0.0 }
  0xa2   : >> { %v319_v40 = vadd.f32 %v318_v37, %v317_v36 }
  0xa4   : >> { %v321_v44 = vadd.f32 %v320_v38, %v319_v40 }
  0xa6   : >> { %635 = vlog2.f32 %v321_v44 }
  0xb0   : >> { %v636_v61 = vpop.eup %635 }
  0xb1   : >> { %v323_v62 = vmul.f32 0.6931472, %v636_v61 }
  0xb3   : >> { %v346_v4 = vmul.f32 %v345_v60, %v323_v62  ;;  %282 = sbr.rel (!%p279_p1) target bundleno = 134 (0x86), region = 104 }
  0xb5   : >> { %v347_v6 = vsub.f32 %v338_v63, %v346_v4 }
  0xb7   : >> { %v348_v7 = vadd.f32 %v831_v5, %v347_v6  }
  0xb9   : >> { %v1219_v5 = vmov %v348_v7  ;;  %v1220_v4 = vmov (%p279_p1), %v348_v7 }
  0xba PF: > { %349 = vst [vmem:[%s1094_s20] sm:$0x3] %v839_v4  ;;  %s515_s9 = sshll.u32 %s819_s15, 5  ;;  %s366_s30 = sshll.u32 %s1094_s20, 4  ;;  %v839_v4 = vphi %v1096_v4, %v1220_v4   ;;  %s367_s30 = int_to_ptr.vmem [resolvable:$true] %s366_s30 }
  0xbb   : > { %s1146_s0 = scalar_lea.hbm %s1193_s3, %s515_s9  ;;  %s351_s24 = scalar_lea.sflag [#allocation4], %s1061_s19 }
  0xbc   : > { %s725_s2 = scalar_lea.vmem %s367_s30, 32  ;;  %s846_s8 = smov [#allocation8]  }
  0xbd   : > { %p726_p2 = scmp.ne.s32.totalorder %s367_s30, %s725_s2  ;;  %s729_s22 = sshll.u32 %s846_s8, 4  ;;  %s730_s22 = int_to_ptr.vmem [resolvable:$false] %s729_s22 }
  0xbe   : > { %s731_s11 = scalar_lea.vmem %s730_s22, 64  ;;  %p732_p8 = scmp.lt.s32.totalorder %s367_s30, %s730_s22 }
  0xbf   : > { %p727_p7 = pnand %p726_p2, %p962_p10  ;;  %p733_p12 = scmp.lt.s32.totalorder %s731_s11, %s725_s2 }
  0xc1   : > { %p728_p4 = pneg %p727_p7  ;;  %p734_p11 = por %p733_p12, %p732_p8 }
  0xc3   : > { %p735_p3 = pnand %p734_p11, %p728_p4 }
  0xc5   : > { %738 = shalt.err (!%p735_p3)
}
  0xc6   : > { %s739_s15 = scalar_lea.hbm %s1146_s0, 32  ;;  %s743_s7 = scalar_lea.hbm %s1193_s3, 64 }
  0xc7   : > { %p740_p6 = scmp.ne.s32.totalorder %s1146_s0, %s739_s15  ;;  %p744_p5 = scmp.lt.u32.totalorder %s1146_s0, %s1193_s3 }
  0xc8   : > { %p745_p9 = scmp.lt.u32.totalorder %s743_s7, %s739_s15  ;;  %p747_p2 = scmp.lt.u32.totalorder %s739_s15, %s1146_s0 }
  0xc9   : > { %p741_p13 = pnand %p740_p6, %p962_p10 }
  0xca   : > { %p746_p1 = por %p745_p9, %p744_p5 }
  0xcb   : > { %p742_p0 = pneg %p741_p13 }
  0xcc   : > { %p748_p7 = por %p747_p2, %p746_p1 }
  0xce   : > { %p749_p4 = pnand %p748_p7, %p742_p0 }
  0xd0   : > { %752 = shalt.err (!%p749_p4)
}
  0xd1   : > { %531 = dma.vmem_to_hbm [thread:$0]  (%p962_p10), %s367_s30, 32, %s1146_s0, %s351_s24  }
  0xd2 PF: > { %s378_s18 = sand.u32 1, %s807_s12   ;;  %p1221_p8 = scmp.ne.s32.totalorder %s1204_s21, 0 }
  0xd3   : > { %p1222_p12 = scmp.ge.s32.totalorder %s827_s17, 2  ;;  %s379_s27 = scalar_lea.sflag [#allocation4], %s378_s18 }
  0xd5   : > { %p545_p11 = pnand %p1222_p12, %p1221_p8 }
  0xd7   : > { %802 = dma.done.wait (!%p545_p11), %s379_s27, 32  }
  0xd8   : > { %804 = vsyncadd (!%p545_p11), %s379_s27, 4294967264  ;;  %s22_s17 = sadd.s32 1, %s827_s17   ;;  %s1223_s12 = smov %s811_s13 }
  0xd9   : > { %p19_p3 = scmp.ge.s32.totalorder %s22_s17, 4   ;;  %s1224_s13 = smov %s815_s14 }
  0xda   : > { %s1225_s14 = smov %s971_s29  ;;  %s1226_s15 = smov %s823_s16 }
  0xdb   : > { %s1227_s16 = smov %s1229_s26  ;;  %21 = sbr.rel (!%p19_p3) target bundleno = 11 (0xb), region = 115 }
  0xe2   :  { %384 = vsyncpa [#allocation3], 1 }
  0xe3   :  { %386 = vsyncpa [#allocation3 + $0x1], 1 }
  0xe4   :  { %387 = vsyncpa [#allocation6], 1 }
  0xe5   :  { %389 = vsyncpa [#allocation6 + $0x1], 1 }
  0xe6   :  { %390 = vsyncpa [#allocation4], 1 }
  0xe7   :  { %392 = vsyncpa [#allocation4 + $0x1], 1 }

</bundles_post_ra>
